<compile_context>
chip_gen: v7x
topology: tpu7x:2x2x1
jax: 0.10.0
libtpu: 0.0.40
codegen_flags: <defaults>
</compile_context>

<pallas_src>
import jax
import jax.numpy as jnp
from jax.experimental import pallas as pl
from jax.experimental.pallas import tpu as pltpu

INP_SIZE = 784
HIDDEN_UNITS = 500
NUM_CLASSES = 10

# Lane-aligned (multiple-of-128) padded sizes.
INP_PAD = 896       # 7 * 128
HIDDEN_PAD = 512    # 4 * 128
CLASSES_PAD = 128   # 1 * 128


def mlp_kernel(x_ref, w1_ref, b1_ref, w2_ref, b2_ref, o_ref):
    # fc1 + ReLU: bf16 x / W1 on the MXU, f32 accumulation.
    h = jnp.dot(x_ref[...], w1_ref[...], preferred_element_type=jnp.float32)
    h = jnp.maximum(h + b1_ref[...], 0.0)           # (TB, 512) + (1, 512), ReLU on VPU
    # fc2: cast hidden back to bf16 for the MXU, accumulate in f32.
    out = jnp.dot(h.astype(jnp.bfloat16), w2_ref[...],
                  preferred_element_type=jnp.float32)
    o_ref[...] = (out + b2_ref[...]).astype(o_ref.dtype)   # lane-dense (TB, 128) store


def _round_up(n, m):
    return ((n + m - 1) // m) * m


@jax.jit
def neural_net_forward(x, w1, b1, w2, b2):
    """relu(x @ w1 + b1) @ w2 + b2 with (in_features, out_features) weights."""
    B = x.shape[0]
    # Batch tile: 256 rows matches the 2x256 MXU on v6e/v7x; small batches use a
    # single 8-row-aligned tile.
    TB = 256 if B >= 256 else _round_up(B, 8)
    B_pad = _round_up(B, TB)

    # Zero-pad to lane-dense shapes (padding is exactly zero -> math unchanged).
    # Weights/activations go to bf16; biases stay f32.
    xp = jnp.zeros((B_pad, INP_PAD), jnp.bfloat16).at[:B, :INP_SIZE].set(
        x.astype(jnp.bfloat16))
    w1p = jnp.zeros((INP_PAD, HIDDEN_PAD), jnp.bfloat16).at[
        :INP_SIZE, :HIDDEN_UNITS].set(w1.astype(jnp.bfloat16))
    b1p = jnp.zeros((1, HIDDEN_PAD), jnp.float32).at[:, :HIDDEN_UNITS].set(
        b1.reshape(1, -1).astype(jnp.float32))
    w2p = jnp.zeros((HIDDEN_PAD, CLASSES_PAD), jnp.bfloat16).at[
        :HIDDEN_UNITS, :NUM_CLASSES].set(w2.astype(jnp.bfloat16))
    b2p = jnp.zeros((1, CLASSES_PAD), jnp.float32).at[:, :NUM_CLASSES].set(
        b2.reshape(1, -1).astype(jnp.float32))

    out_pad = pl.pallas_call(
        mlp_kernel,
        out_shape=jax.ShapeDtypeStruct((B_pad, CLASSES_PAD), jnp.float32),
        grid_spec=pltpu.PrefetchScalarGridSpec(
            num_scalar_prefetch=0,
            grid=(B_pad // TB,),
            in_specs=[
                pl.BlockSpec((TB, INP_PAD), lambda i: (i, 0)),          # x tiles (pipelined)
                pl.BlockSpec((INP_PAD, HIDDEN_PAD), lambda i: (0, 0)),  # W1 resident
                pl.BlockSpec((1, HIDDEN_PAD), lambda i: (0, 0)),        # b1 resident
                pl.BlockSpec((HIDDEN_PAD, CLASSES_PAD), lambda i: (0, 0)),  # W2 resident
                pl.BlockSpec((1, CLASSES_PAD), lambda i: (0, 0)),       # b2 resident
            ],
            out_specs=pl.BlockSpec((TB, CLASSES_PAD), lambda i: (i, 0)),
        ),
        compiler_params=pltpu.CompilerParams(
            dimension_semantics=("parallel",),   # v7x: shard batch tiles across both TCs
            vmem_limit_bytes=16 << 20,           # kernel needs ~2-3 MiB; leave headroom
        ),
    )(xp, w1p, b1p, w2p, b2p)

    # Slice padded output back to the logical (B, 10) result.
    return out_pad[:B, :NUM_CLASSES]


def init_params(key):
    # Deterministic init mimicking PyTorch nn.Linear default:
    # U(-1/sqrt(fan_in), 1/sqrt(fan_in)); weights stored (in, out).
    k1, k2, k3, k4 = jax.random.split(key, 4)
    bound1 = 1.0 / (INP_SIZE ** 0.5)
    bound2 = 1.0 / (HIDDEN_UNITS ** 0.5)
    w1 = jax.random.uniform(k1, (INP_SIZE, HIDDEN_UNITS), jnp.float32, -bound1, bound1)
    b1 = jax.random.uniform(k2, (1, HIDDEN_UNITS), jnp.float32, -bound1, bound1)
    w2 = jax.random.uniform(k3, (HIDDEN_UNITS, NUM_CLASSES), jnp.float32, -bound2, bound2)
    b2 = jax.random.uniform(k4, (1, NUM_CLASSES), jnp.float32, -bound2, bound2)
    return w1, b1, w2, b2


if __name__ == "__main__":
    key = jax.random.PRNGKey(0)
    kx, kp = jax.random.split(key)
    batch = 8
    x = jax.random.normal(kx, (batch, INP_SIZE), jnp.float32)
    w1, b1, w2, b2 = init_params(kp)

    out = neural_net_forward(x, w1, b1, w2, b2)
    out = jax.block_until_ready(out)
    assert out.shape == (batch, NUM_CLASSES)

    # Pure-JAX reference mirroring the kernel's bf16 quantization of x/W/h
    # (f32 accumulation), so only summation-order differences remain.
    xb = x.astype(jnp.bfloat16).astype(jnp.float32)
    w1b = w1.astype(jnp.bfloat16).astype(jnp.float32)
    w2b = w2.astype(jnp.bfloat16).astype(jnp.float32)
    h = jnp.maximum(xb @ w1b + b1, 0.0)
    ref = h.astype(jnp.bfloat16).astype(jnp.float32) @ w2b + b2
    assert jnp.allclose(out, ref, atol=2e-2, rtol=2e-2)

    print("KERNEL_OK")
</pallas_src>

<mosaic_0001>
module attributes {stable_mosaic.version = 11 : i64} {
  func.func @mlp_kernel(%arg0: i32, %arg1: memref<8x896xbf16, #tpu.memory_space<vmem>>, %arg2: memref<896x512xbf16, #tpu.memory_space<vmem>>, %arg3: memref<1x512xf32, #tpu.memory_space<vmem>>, %arg4: memref<512x128xbf16, #tpu.memory_space<vmem>>, %arg5: memref<1x128xf32, #tpu.memory_space<vmem>>, %arg6: memref<8x128xf32, #tpu.memory_space<vmem>>) attributes {dimension_semantics = [#tpu.dimension_semantics<parallel>], iteration_bounds = array<i64: 1>, scalar_prefetch = 0 : i64, scratch_operands = 0 : i64, tpu.core_type = #tpu.core_type<tc>, window_params = [{transform_indices = @transform_0, window_bounds = array<i64: 8, 896>}, {pipeline_mode = #tpu.pipeline_mode<synchronous>, transform_indices = @transform_1, window_bounds = array<i64: 896, 512>}, {pipeline_mode = #tpu.pipeline_mode<synchronous>, transform_indices = @transform_2, window_bounds = array<i64: 1, 512>}, {pipeline_mode = #tpu.pipeline_mode<synchronous>, transform_indices = @transform_3, window_bounds = array<i64: 512, 128>}, {pipeline_mode = #tpu.pipeline_mode<synchronous>, transform_indices = @transform_4, window_bounds = array<i64: 1, 128>}, {transform_indices = @transform_5, window_bounds = array<i64: 8, 128>}]} {
    %c0 = arith.constant 0 : index
    %c0_0 = arith.constant 0 : index
    %0 = vector.load %arg1[%c0, %c0_0] : memref<8x896xbf16, #tpu.memory_space<vmem>>, vector<8x896xbf16>
    %c0_1 = arith.constant 0 : index
    %c0_2 = arith.constant 0 : index
    %1 = vector.load %arg2[%c0_1, %c0_2] : memref<896x512xbf16, #tpu.memory_space<vmem>>, vector<896x512xbf16>
    %cst = arith.constant dense<0.000000e+00> : vector<8x512xf32>
    %2 = tpu.matmul %0, %1, %cst {dimension_numbers = #tpu.dot_dimension_numbers<[1], [0], [0], [1], [0, 0, 1, 1], [], []>} : vector<8x896xbf16>, vector<896x512xbf16>, vector<8x512xf32> -> vector<8x512xf32>
    %c0_3 = arith.constant 0 : index
    %c0_4 = arith.constant 0 : index
    %3 = vector.load %arg3[%c0_3, %c0_4] : memref<1x512xf32, #tpu.memory_space<vmem>>, vector<1x512xf32>
    %4 = vector.broadcast %3 : vector<1x512xf32> to vector<8x512xf32>
    %5 = arith.addf %2, %4 : vector<8x512xf32>
    %cst_5 = arith.constant 0.000000e+00 : f32
    %6 = vector.broadcast %cst_5 : f32 to vector<8x512xf32>
    %7 = arith.maximumf %5, %6 : vector<8x512xf32>
    %8 = arith.truncf %7 : vector<8x512xf32> to vector<8x512xbf16>
    %c0_6 = arith.constant 0 : index
    %c0_7 = arith.constant 0 : index
    %9 = vector.load %arg4[%c0_6, %c0_7] : memref<512x128xbf16, #tpu.memory_space<vmem>>, vector<512x128xbf16>
    %cst_8 = arith.constant dense<0.000000e+00> : vector<8x128xf32>
    %10 = tpu.matmul %8, %9, %cst_8 {dimension_numbers = #tpu.dot_dimension_numbers<[1], [0], [0], [1], [0, 0, 1, 1], [], []>} : vector<8x512xbf16>, vector<512x128xbf16>, vector<8x128xf32> -> vector<8x128xf32>
    %c0_9 = arith.constant 0 : index
    %c0_10 = arith.constant 0 : index
    %11 = vector.load %arg5[%c0_9, %c0_10] : memref<1x128xf32, #tpu.memory_space<vmem>>, vector<1x128xf32>
    %12 = vector.broadcast %11 : vector<1x128xf32> to vector<8x128xf32>
    %13 = arith.addf %10, %12 : vector<8x128xf32>
    %c0_11 = arith.constant 0 : index
    %c0_12 = arith.constant 0 : index
    %14 = vector.load %arg6[%c0_11, %c0_12] : memref<8x128xf32, #tpu.memory_space<vmem>>, vector<8x128xf32>
    tpu.vector_store %arg6[%c0_11, %c0_12], %13 {strides = array<i32>} : memref<8x128xf32, #tpu.memory_space<vmem>>, vector<8x128xf32>,
    return
  }
  func.func @transform_0(%arg0: i32) -> (i32, i32) {
    %c0_i32 = arith.constant 0 : i32
    %c0_i32_0 = arith.constant 0 : i32
    return %arg0, %c0_i32 : i32, i32
  }
  func.func @transform_1(%arg0: i32) -> (i32, i32) {
    %c0_i32 = arith.constant 0 : i32
    %c0_i32_0 = arith.constant 0 : i32
    %c0_i32_1 = arith.constant 0 : i32
    return %c0_i32, %c0_i32_0 : i32, i32
  }
  func.func @transform_2(%arg0: i32) -> (i32, i32) {
    %c0_i32 = arith.constant 0 : i32
    %c0_i32_0 = arith.constant 0 : i32
    %c0_i32_1 = arith.constant 0 : i32
    return %c0_i32, %c0_i32_0 : i32, i32
  }
  func.func @transform_3(%arg0: i32) -> (i32, i32) {
    %c0_i32 = arith.constant 0 : i32
    %c0_i32_0 = arith.constant 0 : i32
    %c0_i32_1 = arith.constant 0 : i32
    return %c0_i32, %c0_i32_0 : i32, i32
  }
  func.func @transform_4(%arg0: i32) -> (i32, i32) {
    %c0_i32 = arith.constant 0 : i32
    %c0_i32_0 = arith.constant 0 : i32
    %c0_i32_1 = arith.constant 0 : i32
    return %c0_i32, %c0_i32_0 : i32, i32
  }
  func.func @transform_5(%arg0: i32) -> (i32, i32) {
    %c0_i32 = arith.constant 0 : i32
    %c0_i32_0 = arith.constant 0 : i32
    return %arg0, %c0_i32 : i32, i32
  }
}

</mosaic_0001>

<bundles_post_ra>
// kernel: neural_net_forward.1
= control target key start
LH: loop header
LB: loop body
LE: loop exit
PB: predicated region body
PF: predicated region fallthrough
CT: control target
= control target key end

     0   :  { %s3690_s0 = inlined_call_operand.vmem [shape: bf16[8,896], index: 0, kind: input, shape index: {}]   ;;  %s3691_s1 = inlined_call_operand.vmem [shape: bf16[896,512], index: 1, kind: input, shape index: {}]   ;;  %s3692_s2 = inlined_call_operand.vmem [shape: f32[1,512], index: 2, kind: input, shape index: {}]   ;;  %s3693_s3 = inlined_call_operand.vmem [shape: bf16[512,128], index: 3, kind: input, shape index: {}]   ;;  %s3694_s4 = inlined_call_operand.vmem [shape: f32[1,128], index: 4, kind: input, shape index: {}]   ;;  %s3695_s5 = inlined_call_operand.hbm [shape: f32[8,128], index: 5, kind: output, shape index: {}]  }
   0x1   :  { %v2449_v0 = vld [vmem:[%s3691_s1 + $0x4] ss:$16 sps:$4 sm:$0xff]   ;;  %v2451_v1 = vld [vmem:[%s3691_s1 + $0xc] ss:$16 sps:$4 sm:$0xff]   ;;  %v2453_v2 = vld [vmem:[%s3691_s1] ss:$16 sps:$4 sm:$0xff]  }
   0x2   :  { %1417 = vmatprep.subr.bf16.mxu0 %v2449_v0  ;;  %v2454_v3 = vld [vmem:[%s3691_s1 + $0x8] ss:$16 sps:$4 sm:$0xff]   ;;  %1581 = vmatprep.subr.bf16.mxu1 %v2451_v1  ;;  %v2455_v4 = vld [vmem:[%s3691_s1 + $0x24] ss:$16 sps:$4 sm:$0xff]   ;;  %v2457_v5 = vld [vmem:[%s3691_s1 + $0x2c] ss:$16 sps:$4 sm:$0xff]  }
   0x3   :  { %1418 = vmatpush1.bf16.msra.mxu0 %v2453_v2  ;;  %1582 = vmatpush1.bf16.msra.mxu1 %v2454_v3  ;;  %v2459_v6 = vld [vmem:[%s3691_s1 + $0x20] ss:$16 sps:$4 sm:$0xff]   ;;  %v2460_v7 = vld [vmem:[%s3691_s1 + $0x28] ss:$16 sps:$4 sm:$0xff]   ;;  %v2461_v8 = vld [vmem:[%s3691_s1 + $0x44] ss:$16 sps:$4 sm:$0xff]  }
   0x4   :  { %1419 = vmatprep.subr.bf16.mxu0 %v2455_v4  ;;  %1583 = vmatprep.subr.bf16.mxu1 %v2457_v5  ;;  %v2463_v9 = vld [vmem:[%s3691_s1 + $0x4c] ss:$16 sps:$4 sm:$0xff]   ;;  %v2465_v10 = vld [vmem:[%s3691_s1 + $0x40] ss:$16 sps:$4 sm:$0xff]   ;;  %v2466_v11 = vld [vmem:[%s3691_s1 + $0x48] ss:$16 sps:$4 sm:$0xff]  }
   0x5   :  { %v2467_v12 = vld [vmem:[%s3691_s1 + $0x64] ss:$16 sps:$4 sm:$0xff]   ;;  %v2469_v13 = vld [vmem:[%s3691_s1 + $0x6c] ss:$16 sps:$4 sm:$0xff]   ;;  %v2471_v14 = vld [vmem:[%s3691_s1 + $0x60] ss:$16 sps:$4 sm:$0xff]  }
   0x6   :  { %v2472_v15 = vld [vmem:[%s3691_s1 + $0x68] ss:$16 sps:$4 sm:$0xff]   ;;  %v2473_v16 = vld [vmem:[%s3691_s1 + $0x84] ss:$16 sps:$4 sm:$0xff]   ;;  %v2475_v17 = vld [vmem:[%s3691_s1 + $0x8c] ss:$16 sps:$4 sm:$0xff]  }
   0x7   :  { %1420 = vmatpush1.bf16.msra.mxu0 %v2459_v6  ;;  %1584 = vmatpush1.bf16.msra.mxu1 %v2460_v7  ;;  %v2477_v18 = vld [vmem:[%s3691_s1 + $0x80] ss:$16 sps:$4 sm:$0xff]   ;;  %v2478_v19 = vld [vmem:[%s3691_s1 + $0x88] ss:$16 sps:$4 sm:$0xff]   ;;  %v2479_v20 = vld [vmem:[%s3691_s1 + $0xa4] ss:$16 sps:$4 sm:$0xff]  }
   0x8   :  { %1421 = vmatprep.subr.bf16.mxu0 %v2461_v8  ;;  %1585 = vmatprep.subr.bf16.mxu1 %v2463_v9  ;;  %v2481_v21 = vld [vmem:[%s3691_s1 + $0xac] ss:$16 sps:$4 sm:$0xff]   ;;  %v2483_v22 = vld [vmem:[%s3691_s1 + $0xa0] ss:$16 sps:$4 sm:$0xff]   ;;  %v2484_v23 = vld [vmem:[%s3691_s1 + $0xa8] ss:$16 sps:$4 sm:$0xff]  }
   0x9   :  { %v2485_v24 = vld [vmem:[%s3691_s1 + $0xc4] ss:$16 sps:$4 sm:$0xff]   ;;  %v2487_v25 = vld [vmem:[%s3691_s1 + $0xcc] ss:$16 sps:$4 sm:$0xff]   ;;  %v2489_v26 = vld [vmem:[%s3691_s1 + $0xc0] ss:$16 sps:$4 sm:$0xff]  }
   0xa   :  { %v2490_v27 = vld [vmem:[%s3691_s1 + $0xc8] ss:$16 sps:$4 sm:$0xff]   ;;  %v2491_v28 = vld [vmem:[%s3691_s1 + $0xe4] ss:$16 sps:$4 sm:$0xff]   ;;  %v2493_v29 = vld [vmem:[%s3691_s1 + $0xec] ss:$16 sps:$4 sm:$0xff]  }
   0xb   :  { %1422 = vmatpush1.bf16.msra.mxu0 %v2465_v10  ;;  %1586 = vmatpush1.bf16.msra.mxu1 %v2466_v11  ;;  %v2495_v30 = vld [vmem:[%s3691_s1 + $0xe0] ss:$16 sps:$4 sm:$0xff]   ;;  %v2496_v31 = vld [vmem:[%s3691_s1 + $0xe8] ss:$16 sps:$4 sm:$0xff]   ;;  %v2497_v32 = vld [vmem:[%s3691_s1 + $0x104] ss:$16 sps:$4 sm:$0xff]  }
   0xc   :  { %1423 = vmatprep.subr.bf16.mxu0 %v2467_v12  ;;  %1587 = vmatprep.subr.bf16.mxu1 %v2469_v13  ;;  %v2499_v33 = vld [vmem:[%s3691_s1 + $0x10c] ss:$16 sps:$4 sm:$0xff]   ;;  %v2501_v34 = vld [vmem:[%s3691_s1 + $0x100] ss:$16 sps:$4 sm:$0xff]   ;;  %v2502_v35 = vld [vmem:[%s3691_s1 + $0x108] ss:$16 sps:$4 sm:$0xff]  }
   0xd   :  { %v2503_v36 = vld [vmem:[%s3691_s1 + $0x124] ss:$16 sps:$4 sm:$0xff]   ;;  %v2505_v37 = vld [vmem:[%s3691_s1 + $0x12c] ss:$16 sps:$4 sm:$0xff]   ;;  %v2507_v38 = vld [vmem:[%s3691_s1 + $0x120] ss:$16 sps:$4 sm:$0xff]  }
   0xe   :  { %v2508_v39 = vld [vmem:[%s3691_s1 + $0x128] ss:$16 sps:$4 sm:$0xff]   ;;  %v2509_v40 = vld [vmem:[%s3691_s1 + $0x144] ss:$16 sps:$4 sm:$0xff]   ;;  %v2511_v41 = vld [vmem:[%s3691_s1 + $0x14c] ss:$16 sps:$4 sm:$0xff]  }
   0xf   :  { %1424 = vmatpush1.bf16.msra.mxu0 %v2471_v14  ;;  %1588 = vmatpush1.bf16.msra.mxu1 %v2472_v15  ;;  %v2513_v42 = vld [vmem:[%s3691_s1 + $0x140] ss:$16 sps:$4 sm:$0xff]   ;;  %v2514_v43 = vld [vmem:[%s3691_s1 + $0x148] ss:$16 sps:$4 sm:$0xff]   ;;  %v2515_v44 = vld [vmem:[%s3691_s1 + $0x164] ss:$16 sps:$4 sm:$0xff]  }
  0x10   :  { %1425 = vmatprep.subr.bf16.mxu0 %v2473_v16  ;;  %1589 = vmatprep.subr.bf16.mxu1 %v2475_v17  ;;  %v2517_v45 = vld [vmem:[%s3691_s1 + $0x16c] ss:$16 sps:$4 sm:$0xff]   ;;  %v22_v46 = vld [vmem:[%s3690_s0] sm:$0xff]  ;;  %v2520_v49 = vld [vmem:[%s3691_s1 + $0x168] ss:$16 sps:$4 sm:$0xff]  }
  0x11   :  { %v2519_v47 = vld [vmem:[%s3691_s1 + $0x160] ss:$16 sps:$4 sm:$0xff]   ;;  %v2112_v48 = vcombine.high %v22_v46, %v22_v46  ;;  %v2521_v50 = vld [vmem:[%s3691_s1 + $0x184] ss:$16 sps:$4 sm:$0xff]   ;;  %v2523_v51 = vld [vmem:[%s3691_s1 + $0x18c] ss:$16 sps:$4 sm:$0xff]   ;;  %v2111_v4 = vcombine.low %v22_v46, %v22_v46 }
  0x12   :  { %v2525_v52 = vld [vmem:[%s3691_s1 + $0x180] ss:$16 sps:$4 sm:$0xff]   ;;  %v2526_v53 = vld [vmem:[%s3691_s1 + $0x188] ss:$16 sps:$4 sm:$0xff]   ;;  %v2527_v54 = vld [vmem:[%s3691_s1 + $0x1a4] ss:$16 sps:$4 sm:$0xff]  }
  0x13   :  { %1426 = vmatpush1.bf16.msra.mxu0 %v2477_v18  ;;  %1590 = vmatpush1.bf16.msra.mxu1 %v2478_v19  ;;  %v2529_v55 = vld [vmem:[%s3691_s1 + $0x1ac] ss:$16 sps:$4 sm:$0xff]   ;;  %v2531_v56 = vld [vmem:[%s3691_s1 + $0x1a0] ss:$16 sps:$4 sm:$0xff]   ;;  %v2532_v57 = vld [vmem:[%s3691_s1 + $0x1a8] ss:$16 sps:$4 sm:$0xff]  }
  0x14   :  { %1427 = vmatprep.subr.bf16.mxu0 %v2479_v20  ;;  %1591 = vmatprep.subr.bf16.mxu1 %v2481_v21  ;;  %v2533_v58 = vld [vmem:[%s3691_s1 + $0x1c4] ss:$16 sps:$4 sm:$0xff]   ;;  %v2535_v59 = vld [vmem:[%s3691_s1 + $0x1cc] ss:$16 sps:$4 sm:$0xff]   ;;  %v2537_v60 = vld [vmem:[%s3691_s1 + $0x1c0] ss:$16 sps:$4 sm:$0xff]  }
  0x15   :  { %1449 = vmatprep.mubr.bf16.mxu0 %v2112_v48  ;;  %1613 = vmatprep.mubr.bf16.mxu1 %v2112_v48  ;;  %v2538_v61 = vld [vmem:[%s3691_s1 + $0x1c8] ss:$16 sps:$4 sm:$0xff]   ;;  %v2539_v62 = vld [vmem:[%s3691_s1 + $0x1e4] ss:$16 sps:$4 sm:$0xff]   ;;  %v2541_v63 = vld [vmem:[%s3691_s1 + $0x1ec] ss:$16 sps:$4 sm:$0xff]  }
  0x16   :  { %v2543_v0 = vld [vmem:[%s3691_s1 + $0x1e0] ss:$16 sps:$4 sm:$0xff]   ;;  %v2544_v1 = vld [vmem:[%s3691_s1 + $0x1e8] ss:$16 sps:$4 sm:$0xff]   ;;  %v2549_v2 = vld [vmem:[%s3691_s1 + $0x204] ss:$16 sps:$4 sm:$0xff]  }
  0x17   :  { %1428 = vmatpush1.bf16.msra.mxu0 %v2483_v22  ;;  %1592 = vmatpush1.bf16.msra.mxu1 %v2484_v23  ;;  %v2552_v3 = vld [vmem:[%s3691_s1 + $0x20c] ss:$16 sps:$4 sm:$0xff]   ;;  %v2547_v5 = vld [vmem:[%s3691_s1 + $0x200] ss:$16 sps:$4 sm:$0xff]   ;;  %v2550_v6 = vld [vmem:[%s3691_s1 + $0x208] ss:$16 sps:$4 sm:$0xff]  }
  0x18   :  { %1429 = vmatprep.subr.bf16.mxu0 %v2485_v24  ;;  %1593 = vmatprep.subr.bf16.mxu1 %v2487_v25  ;;  %v2555_v7 = vld [vmem:[%s3691_s1 + $0x224] ss:$16 sps:$4 sm:$0xff]   ;;  %v2558_v8 = vld [vmem:[%s3691_s1 + $0x22c] ss:$16 sps:$4 sm:$0xff]   ;;  %v2553_v9 = vld [vmem:[%s3691_s1 + $0x220] ss:$16 sps:$4 sm:$0xff]  }
  0x19   :  { %v2556_v10 = vld [vmem:[%s3691_s1 + $0x228] ss:$16 sps:$4 sm:$0xff]   ;;  %v2561_v11 = vld [vmem:[%s3691_s1 + $0x244] ss:$16 sps:$4 sm:$0xff]   ;;  %v2564_v12 = vld [vmem:[%s3691_s1 + $0x24c] ss:$16 sps:$4 sm:$0xff]  }
  0x1a   :  { %v2559_v13 = vld [vmem:[%s3691_s1 + $0x240] ss:$16 sps:$4 sm:$0xff]   ;;  %v2562_v14 = vld [vmem:[%s3691_s1 + $0x248] ss:$16 sps:$4 sm:$0xff]   ;;  %v2567_v15 = vld [vmem:[%s3691_s1 + $0x264] ss:$16 sps:$4 sm:$0xff]  }
  0x1b   :  { %1430 = vmatpush1.bf16.msra.mxu0 %v2489_v26  ;;  %1594 = vmatpush1.bf16.msra.mxu1 %v2490_v27  ;;  %v2570_v16 = vld [vmem:[%s3691_s1 + $0x26c] ss:$16 sps:$4 sm:$0xff]   ;;  %v2565_v17 = vld [vmem:[%s3691_s1 + $0x260] ss:$16 sps:$4 sm:$0xff]   ;;  %v2568_v18 = vld [vmem:[%s3691_s1 + $0x268] ss:$16 sps:$4 sm:$0xff]  }
  0x1c   :  { %1431 = vmatprep.subr.bf16.mxu0 %v2491_v28  ;;  %1595 = vmatprep.subr.bf16.mxu1 %v2493_v29  ;;  %v2573_v19 = vld [vmem:[%s3691_s1 + $0x284] ss:$16 sps:$4 sm:$0xff]   ;;  %v2576_v20 = vld [vmem:[%s3691_s1 + $0x28c] ss:$16 sps:$4 sm:$0xff]   ;;  %v2571_v21 = vld [vmem:[%s3691_s1 + $0x280] ss:$16 sps:$4 sm:$0xff]  }
  0x1d   :  { %v2574_v22 = vld [vmem:[%s3691_s1 + $0x288] ss:$16 sps:$4 sm:$0xff]   ;;  %v2579_v23 = vld [vmem:[%s3691_s1 + $0x2a4] ss:$16 sps:$4 sm:$0xff]   ;;  %v2582_v24 = vld [vmem:[%s3691_s1 + $0x2ac] ss:$16 sps:$4 sm:$0xff]  }
  0x1e   :  { %v2577_v25 = vld [vmem:[%s3691_s1 + $0x2a0] ss:$16 sps:$4 sm:$0xff]   ;;  %v2580_v26 = vld [vmem:[%s3691_s1 + $0x2a8] ss:$16 sps:$4 sm:$0xff]   ;;  %v2585_v27 = vld [vmem:[%s3691_s1 + $0x2c4] ss:$16 sps:$4 sm:$0xff]  }
  0x1f   :  { %1432 = vmatpush1.bf16.msra.mxu0 %v2495_v30  ;;  %1596 = vmatpush1.bf16.msra.mxu1 %v2496_v31  ;;  %v2588_v28 = vld [vmem:[%s3691_s1 + $0x2cc] ss:$16 sps:$4 sm:$0xff]   ;;  %v2583_v31 = vld [vmem:[%s3691_s1 + $0x2c0] ss:$16 sps:$4 sm:$0xff]   ;;  %v2610_v48 = vld [vmem:[%s3691_s1 + $0x348] ss:$16 sps:$4 sm:$0xff]  }
  0x20   :  { %1433 = vmatprep.subr.bf16.mxu0 %v2497_v32  ;;  %1597 = vmatprep.subr.bf16.mxu1 %v2499_v33  ;;  %v3156_v29 = vld [vmem:[%s3690_s0 + $0x8] sm:$0xff]  ;;  %v2591_v33 = vld [vmem:[%s3691_s1 + $0x2e4] ss:$16 sps:$4 sm:$0xff]  }
  0x21   :  { %v2114_v30 = vcombine.high %v3156_v29, %v3156_v29  ;;  %v2586_v32 = vld [vmem:[%s3691_s1 + $0x2c8] ss:$16 sps:$4 sm:$0xff]   ;;  %v2612_v46 = vld [vmem:[%s3691_s1 + $0x34c] ss:$16 sps:$4 sm:$0xff]  }
  0x23   :  { %1434 = vmatpush1.bf16.msra.mxu0 %v2501_v34  ;;  %1598 = vmatpush1.bf16.msra.mxu1 %v2502_v35  ;;  %v2594_v34 = vld [vmem:[%s3691_s1 + $0x2ec] ss:$16 sps:$4 sm:$0xff]   ;;  %v2589_v35 = vld [vmem:[%s3691_s1 + $0x2e0] ss:$16 sps:$4 sm:$0xff]  }
  0x24   :  { %1435 = vmatprep.subr.bf16.mxu0 %v2503_v36  ;;  %1599 = vmatprep.subr.bf16.mxu1 %v2505_v37  ;;  %v2592_v36 = vld [vmem:[%s3691_s1 + $0x2e8] ss:$16 sps:$4 sm:$0xff]   ;;  %v2597_v37 = vld [vmem:[%s3691_s1 + $0x304] ss:$16 sps:$4 sm:$0xff]  }
  0x27   :  { %1436 = vmatpush1.bf16.msra.mxu0 %v2507_v38  ;;  %1600 = vmatpush1.bf16.msra.mxu1 %v2508_v39  ;;  %v2600_v38 = vld [vmem:[%s3691_s1 + $0x30c] ss:$16 sps:$4 sm:$0xff]   ;;  %v2595_v39 = vld [vmem:[%s3691_s1 + $0x300] ss:$16 sps:$4 sm:$0xff]  }
  0x28   :  { %1437 = vmatprep.subr.bf16.mxu0 %v2509_v40  ;;  %1601 = vmatprep.subr.bf16.mxu1 %v2511_v41  ;;  %v2598_v40 = vld [vmem:[%s3691_s1 + $0x308] ss:$16 sps:$4 sm:$0xff]   ;;  %v2603_v41 = vld [vmem:[%s3691_s1 + $0x324] ss:$16 sps:$4 sm:$0xff]  }
  0x2b   :  { %1438 = vmatpush1.bf16.msra.mxu0 %v2513_v42  ;;  %1602 = vmatpush1.bf16.msra.mxu1 %v2514_v43  ;;  %v2606_v42 = vld [vmem:[%s3691_s1 + $0x32c] ss:$16 sps:$4 sm:$0xff]   ;;  %v2601_v43 = vld [vmem:[%s3691_s1 + $0x320] ss:$16 sps:$4 sm:$0xff]  }
  0x2c   :  { %1439 = vmatprep.subr.bf16.mxu0 %v2515_v44  ;;  %1603 = vmatprep.subr.bf16.mxu1 %v2517_v45  ;;  %v2604_v44 = vld [vmem:[%s3691_s1 + $0x328] ss:$16 sps:$4 sm:$0xff]   ;;  %v2609_v45 = vld [vmem:[%s3691_s1 + $0x344] ss:$16 sps:$4 sm:$0xff]  }
  0x2f   :  { %1440 = vmatpush1.bf16.msra.mxu0 %v2519_v47  ;;  %1604 = vmatpush1.bf16.msra.mxu1 %v2520_v49  ;;  %v2607_v47 = vld [vmem:[%s3691_s1 + $0x340] ss:$16 sps:$4 sm:$0xff]   ;;  %v2615_v49 = vld [vmem:[%s3691_s1 + $0x364] ss:$16 sps:$4 sm:$0xff]  }
  0x30   :  { %1441 = vmatprep.subr.bf16.mxu0 %v2521_v50  ;;  %1605 = vmatprep.subr.bf16.mxu1 %v2523_v51  ;;  %v2618_v50 = vld [vmem:[%s3691_s1 + $0x36c] ss:$16 sps:$4 sm:$0xff]   ;;  %v2613_v51 = vld [vmem:[%s3691_s1 + $0x360] ss:$16 sps:$4 sm:$0xff]  }
  0x33   :  { %1442 = vmatpush1.bf16.msra.mxu0 %v2525_v52  ;;  %1606 = vmatpush1.bf16.msra.mxu1 %v2526_v53  ;;  %v2616_v52 = vld [vmem:[%s3691_s1 + $0x368] ss:$16 sps:$4 sm:$0xff]   ;;  %v2621_v53 = vld [vmem:[%s3691_s1 + $0x384] ss:$16 sps:$4 sm:$0xff]  }
  0x34   :  { %1443 = vmatprep.subr.bf16.mxu0 %v2527_v54  ;;  %1607 = vmatprep.subr.bf16.mxu1 %v2529_v55  ;;  %v2624_v54 = vld [vmem:[%s3691_s1 + $0x38c] ss:$16 sps:$4 sm:$0xff]   ;;  %v2619_v55 = vld [vmem:[%s3691_s1 + $0x380] ss:$16 sps:$4 sm:$0xff]  }
  0x37   :  { %1444 = vmatpush1.bf16.msra.mxu0 %v2531_v56  ;;  %1608 = vmatpush1.bf16.msra.mxu1 %v2532_v57  ;;  %v2622_v56 = vld [vmem:[%s3691_s1 + $0x388] ss:$16 sps:$4 sm:$0xff]   ;;  %v2627_v57 = vld [vmem:[%s3691_s1 + $0x3a4] ss:$16 sps:$4 sm:$0xff]  }
  0x38   :  { %1445 = vmatprep.subr.bf16.mxu0 %v2533_v58  ;;  %1609 = vmatprep.subr.bf16.mxu1 %v2535_v59  ;;  %v2630_v58 = vld [vmem:[%s3691_s1 + $0x3ac] ss:$16 sps:$4 sm:$0xff]   ;;  %v2625_v59 = vld [vmem:[%s3691_s1 + $0x3a0] ss:$16 sps:$4 sm:$0xff]  }
  0x3b   :  { %1446 = vmatpush1.bf16.msra.mxu0 %v2537_v60  ;;  %1610 = vmatpush1.bf16.msra.mxu1 %v2538_v61  ;;  %v2628_v60 = vld [vmem:[%s3691_s1 + $0x3a8] ss:$16 sps:$4 sm:$0xff]   ;;  %v2633_v61 = vld [vmem:[%s3691_s1 + $0x3c4] ss:$16 sps:$4 sm:$0xff]  }
  0x3c   :  { %1447 = vmatprep.subr.bf16.mxu0 %v2539_v62  ;;  %1611 = vmatprep.subr.bf16.mxu1 %v2541_v63  ;;  %v2636_v62 = vld [vmem:[%s3691_s1 + $0x3cc] ss:$16 sps:$4 sm:$0xff]   ;;  %v2631_v63 = vld [vmem:[%s3691_s1 + $0x3c0] ss:$16 sps:$4 sm:$0xff]  }
  0x3f   :  { %1448 = vmatpush1.bf16.msra.mxu0 %v2543_v0  ;;  %1612 = vmatpush1.bf16.msra.mxu1 %v2544_v1  ;;  %v2634_v0 = vld [vmem:[%s3691_s1 + $0x3c8] ss:$16 sps:$4 sm:$0xff]   ;;  %v2639_v1 = vld [vmem:[%s3691_s1 + $0x3e4] ss:$16 sps:$4 sm:$0xff]  }
  0x40   :  { %1458 = vmatprep.subr.bf16.mxu0 %v2549_v2  ;;  %1622 = vmatprep.subr.bf16.mxu1 %v2552_v3  ;;  %v2642_v2 = vld [vmem:[%s3691_s1 + $0x3ec] ss:$16 sps:$4 sm:$0xff]   ;;  %v2637_v3 = vld [vmem:[%s3691_s1 + $0x3e0] ss:$16 sps:$4 sm:$0xff]  }
  0x42   :  { %1450 = vmatmul.mubr.bf16.vlgmr.msra.gmra.mrb[0].mxu0 %v2111_v4  ;;  %1614 = vmatmul.mubr.bf16.vlgmr.msra.gmra.mrb[0].mxu1 %v2111_v4  ;;  %v2640_v4 = vld [vmem:[%s3691_s1 + $0x3e8] ss:$16 sps:$4 sm:$0xff]  }
  0x43   :  { %1459 = vmatpush1.bf16.msra.mxu0 %v2547_v5  ;;  %1623 = vmatpush1.bf16.msra.mxu1 %v2550_v6  ;;  %v2647_v5 = vld [vmem:[%s3691_s1 + $0x404] ss:$16 sps:$4 sm:$0xff]   ;;  %v2650_v6 = vld [vmem:[%s3691_s1 + $0x40c] ss:$16 sps:$4 sm:$0xff]  }
  0x44   :  { %1460 = vmatprep.subr.bf16.mxu0 %v2555_v7  ;;  %1624 = vmatprep.subr.bf16.mxu1 %v2558_v8  ;;  %v2113_v7 = vcombine.low %v3156_v29, %v3156_v29  ;;  %v2645_v8 = vld [vmem:[%s3691_s1 + $0x400] ss:$16 sps:$4 sm:$0xff]   ;;  %v2680_v29 = vld [vmem:[%s3691_s1 + $0x4ac] ss:$16 sps:$4 sm:$0xff]  }
  0x45   :  { %1490 = vmatprep.mubr.bf16.mxu0 %v2114_v30  ;;  %1654 = vmatprep.mubr.bf16.mxu1 %v2114_v30  ;;  %v2675_v30 = vld [vmem:[%s3691_s1 + $0x4a0] ss:$16 sps:$4 sm:$0xff]  }
  0x47   :  { %1461 = vmatpush1.bf16.msra.mxu0 %v2553_v9  ;;  %1625 = vmatpush1.bf16.msra.mxu1 %v2556_v10  ;;  %v2648_v9 = vld [vmem:[%s3691_s1 + $0x408] ss:$16 sps:$4 sm:$0xff]   ;;  %v2653_v10 = vld [vmem:[%s3691_s1 + $0x424] ss:$16 sps:$4 sm:$0xff]  }
  0x48   :  { %1462 = vmatprep.subr.bf16.mxu0 %v2561_v11  ;;  %1626 = vmatprep.subr.bf16.mxu1 %v2564_v12  ;;  %v3294_v11 = vld [vmem:[%s3690_s0 + $0x10] sm:$0xff]  ;;  %v2656_v12 = vld [vmem:[%s3691_s1 + $0x42c] ss:$16 sps:$4 sm:$0xff]  }
  0x4b   :  { %1463 = vmatpush1.bf16.msra.mxu0 %v2559_v13  ;;  %1627 = vmatpush1.bf16.msra.mxu1 %v2562_v14  ;;  %v2116_v13 = vcombine.high %v3294_v11, %v3294_v11  ;;  %v2651_v14 = vld [vmem:[%s3691_s1 + $0x420] ss:$16 sps:$4 sm:$0xff]  }
  0x4c   :  { %1464 = vmatprep.subr.bf16.mxu0 %v2567_v15  ;;  %1628 = vmatprep.subr.bf16.mxu1 %v2570_v16  ;;  %v2654_v15 = vld [vmem:[%s3691_s1 + $0x428] ss:$16 sps:$4 sm:$0xff]   ;;  %v2659_v16 = vld [vmem:[%s3691_s1 + $0x444] ss:$16 sps:$4 sm:$0xff]  }
  0x4f   :  { %1465 = vmatpush1.bf16.msra.mxu0 %v2565_v17  ;;  %1629 = vmatpush1.bf16.msra.mxu1 %v2568_v18  ;;  %v2662_v17 = vld [vmem:[%s3691_s1 + $0x44c] ss:$16 sps:$4 sm:$0xff]   ;;  %v2657_v18 = vld [vmem:[%s3691_s1 + $0x440] ss:$16 sps:$4 sm:$0xff]  }
  0x50   :  { %1466 = vmatprep.subr.bf16.mxu0 %v2573_v19  ;;  %1630 = vmatprep.subr.bf16.mxu1 %v2576_v20  ;;  %v2660_v19 = vld [vmem:[%s3691_s1 + $0x448] ss:$16 sps:$4 sm:$0xff]   ;;  %v2665_v20 = vld [vmem:[%s3691_s1 + $0x464] ss:$16 sps:$4 sm:$0xff]  }
  0x53   :  { %1467 = vmatpush1.bf16.msra.mxu0 %v2571_v21  ;;  %1631 = vmatpush1.bf16.msra.mxu1 %v2574_v22  ;;  %v2668_v21 = vld [vmem:[%s3691_s1 + $0x46c] ss:$16 sps:$4 sm:$0xff]   ;;  %v2663_v22 = vld [vmem:[%s3691_s1 + $0x460] ss:$16 sps:$4 sm:$0xff]  }
  0x54   :  { %1468 = vmatprep.subr.bf16.mxu0 %v2579_v23  ;;  %1632 = vmatprep.subr.bf16.mxu1 %v2582_v24  ;;  %v2666_v23 = vld [vmem:[%s3691_s1 + $0x468] ss:$16 sps:$4 sm:$0xff]   ;;  %v2671_v24 = vld [vmem:[%s3691_s1 + $0x484] ss:$16 sps:$4 sm:$0xff]  }
  0x57   :  { %1469 = vmatpush1.bf16.msra.mxu0 %v2577_v25  ;;  %1633 = vmatpush1.bf16.msra.mxu1 %v2580_v26  ;;  %v2674_v25 = vld [vmem:[%s3691_s1 + $0x48c] ss:$16 sps:$4 sm:$0xff]   ;;  %v2669_v26 = vld [vmem:[%s3691_s1 + $0x480] ss:$16 sps:$4 sm:$0xff]  }
  0x58   :  { %1470 = vmatprep.subr.bf16.mxu0 %v2585_v27  ;;  %1634 = vmatprep.subr.bf16.mxu1 %v2588_v28  ;;  %v2672_v27 = vld [vmem:[%s3691_s1 + $0x488] ss:$16 sps:$4 sm:$0xff]   ;;  %v2677_v28 = vld [vmem:[%s3691_s1 + $0x4a4] ss:$16 sps:$4 sm:$0xff]  }
  0x5b   :  { %1471 = vmatpush1.bf16.msra.mxu0 %v2583_v31  ;;  %1635 = vmatpush1.bf16.msra.mxu1 %v2586_v32  ;;  %v2678_v31 = vld [vmem:[%s3691_s1 + $0x4a8] ss:$16 sps:$4 sm:$0xff]   ;;  %v2683_v32 = vld [vmem:[%s3691_s1 + $0x4c4] ss:$16 sps:$4 sm:$0xff]  }
  0x5c   :  { %1472 = vmatprep.subr.bf16.mxu0 %v2591_v33  ;;  %1636 = vmatprep.subr.bf16.mxu1 %v2594_v34  ;;  %v2686_v33 = vld [vmem:[%s3691_s1 + $0x4cc] ss:$16 sps:$4 sm:$0xff]   ;;  %v2681_v34 = vld [vmem:[%s3691_s1 + $0x4c0] ss:$16 sps:$4 sm:$0xff]  }
  0x5f   :  { %1473 = vmatpush1.bf16.msra.mxu0 %v2589_v35  ;;  %1637 = vmatpush1.bf16.msra.mxu1 %v2592_v36  ;;  %v2684_v35 = vld [vmem:[%s3691_s1 + $0x4c8] ss:$16 sps:$4 sm:$0xff]   ;;  %v2689_v36 = vld [vmem:[%s3691_s1 + $0x4e4] ss:$16 sps:$4 sm:$0xff]  }
  0x60   :  { %1474 = vmatprep.subr.bf16.mxu0 %v2597_v37  ;;  %1638 = vmatprep.subr.bf16.mxu1 %v2600_v38  ;;  %v2692_v37 = vld [vmem:[%s3691_s1 + $0x4ec] ss:$16 sps:$4 sm:$0xff]   ;;  %v2687_v38 = vld [vmem:[%s3691_s1 + $0x4e0] ss:$16 sps:$4 sm:$0xff]  }
  0x63   :  { %1475 = vmatpush1.bf16.msra.mxu0 %v2595_v39  ;;  %1639 = vmatpush1.bf16.msra.mxu1 %v2598_v40  ;;  %v2690_v39 = vld [vmem:[%s3691_s1 + $0x4e8] ss:$16 sps:$4 sm:$0xff]   ;;  %v2695_v40 = vld [vmem:[%s3691_s1 + $0x504] ss:$16 sps:$4 sm:$0xff]  }
  0x64   :  { %1476 = vmatprep.subr.bf16.mxu0 %v2603_v41  ;;  %1640 = vmatprep.subr.bf16.mxu1 %v2606_v42  ;;  %v2698_v41 = vld [vmem:[%s3691_s1 + $0x50c] ss:$16 sps:$4 sm:$0xff]   ;;  %v2693_v42 = vld [vmem:[%s3691_s1 + $0x500] ss:$16 sps:$4 sm:$0xff]  }
  0x67   :  { %1477 = vmatpush1.bf16.msra.mxu0 %v2601_v43  ;;  %1641 = vmatpush1.bf16.msra.mxu1 %v2604_v44  ;;  %v2696_v43 = vld [vmem:[%s3691_s1 + $0x508] ss:$16 sps:$4 sm:$0xff]   ;;  %v2701_v44 = vld [vmem:[%s3691_s1 + $0x524] ss:$16 sps:$4 sm:$0xff]  }
  0x68   :  { %1478 = vmatprep.subr.bf16.mxu0 %v2609_v45  ;;  %1642 = vmatprep.subr.bf16.mxu1 %v2612_v46  ;;  %v2704_v45 = vld [vmem:[%s3691_s1 + $0x52c] ss:$16 sps:$4 sm:$0xff]   ;;  %v2699_v46 = vld [vmem:[%s3691_s1 + $0x520] ss:$16 sps:$4 sm:$0xff]  }
  0x6b   :  { %1479 = vmatpush1.bf16.msra.mxu0 %v2607_v47  ;;  %1643 = vmatpush1.bf16.msra.mxu1 %v2610_v48  ;;  %v2702_v47 = vld [vmem:[%s3691_s1 + $0x528] ss:$16 sps:$4 sm:$0xff]   ;;  %v2707_v48 = vld [vmem:[%s3691_s1 + $0x544] ss:$16 sps:$4 sm:$0xff]  }
  0x6c   :  { %1480 = vmatprep.subr.bf16.mxu0 %v2615_v49  ;;  %1644 = vmatprep.subr.bf16.mxu1 %v2618_v50  ;;  %v2710_v49 = vld [vmem:[%s3691_s1 + $0x54c] ss:$16 sps:$4 sm:$0xff]   ;;  %v2705_v50 = vld [vmem:[%s3691_s1 + $0x540] ss:$16 sps:$4 sm:$0xff]  }
  0x6f   :  { %1481 = vmatpush1.bf16.msra.mxu0 %v2613_v51  ;;  %1645 = vmatpush1.bf16.msra.mxu1 %v2616_v52  ;;  %v2708_v51 = vld [vmem:[%s3691_s1 + $0x548] ss:$16 sps:$4 sm:$0xff]   ;;  %v2713_v52 = vld [vmem:[%s3691_s1 + $0x564] ss:$16 sps:$4 sm:$0xff]  }
  0x70   :  { %1482 = vmatprep.subr.bf16.mxu0 %v2621_v53  ;;  %1646 = vmatprep.subr.bf16.mxu1 %v2624_v54  ;;  %v2716_v53 = vld [vmem:[%s3691_s1 + $0x56c] ss:$16 sps:$4 sm:$0xff]   ;;  %v2711_v54 = vld [vmem:[%s3691_s1 + $0x560] ss:$16 sps:$4 sm:$0xff]  }
  0x73   :  { %1483 = vmatpush1.bf16.msra.mxu0 %v2619_v55  ;;  %1647 = vmatpush1.bf16.msra.mxu1 %v2622_v56  ;;  %v2714_v55 = vld [vmem:[%s3691_s1 + $0x568] ss:$16 sps:$4 sm:$0xff]   ;;  %v2719_v56 = vld [vmem:[%s3691_s1 + $0x584] ss:$16 sps:$4 sm:$0xff]  }
  0x74   :  { %1484 = vmatprep.subr.bf16.mxu0 %v2627_v57  ;;  %1648 = vmatprep.subr.bf16.mxu1 %v2630_v58  ;;  %v2722_v57 = vld [vmem:[%s3691_s1 + $0x58c] ss:$16 sps:$4 sm:$0xff]   ;;  %v2717_v58 = vld [vmem:[%s3691_s1 + $0x580] ss:$16 sps:$4 sm:$0xff]  }
  0x77   :  { %1485 = vmatpush1.bf16.msra.mxu0 %v2625_v59  ;;  %1649 = vmatpush1.bf16.msra.mxu1 %v2628_v60  ;;  %v2720_v59 = vld [vmem:[%s3691_s1 + $0x588] ss:$16 sps:$4 sm:$0xff]   ;;  %v2725_v60 = vld [vmem:[%s3691_s1 + $0x5a4] ss:$16 sps:$4 sm:$0xff]  }
  0x78   :  { %1486 = vmatprep.subr.bf16.mxu0 %v2633_v61  ;;  %1650 = vmatprep.subr.bf16.mxu1 %v2636_v62  ;;  %v2728_v61 = vld [vmem:[%s3691_s1 + $0x5ac] ss:$16 sps:$4 sm:$0xff]   ;;  %v2723_v62 = vld [vmem:[%s3691_s1 + $0x5a0] ss:$16 sps:$4 sm:$0xff]  }
  0x7b   :  { %1487 = vmatpush1.bf16.msra.mxu0 %v2631_v63  ;;  %1651 = vmatpush1.bf16.msra.mxu1 %v2634_v0  ;;  %v2726_v63 = vld [vmem:[%s3691_s1 + $0x5a8] ss:$16 sps:$4 sm:$0xff]  }
  0x7c   :  { %1488 = vmatprep.subr.bf16.mxu0 %v2639_v1  ;;  %1652 = vmatprep.subr.bf16.mxu1 %v2642_v2 }
  0x7f   :  { %1489 = vmatpush1.bf16.msra.mxu0 %v2637_v3  ;;  %1653 = vmatpush1.bf16.msra.mxu1 %v2640_v4 }
  0x80   :  { %1499 = vmatprep.subr.bf16.mxu0 %v2647_v5  ;;  %1663 = vmatprep.subr.bf16.mxu1 %v2650_v6 }
  0x82   :  { %1491 = vmatmul.mubr.bf16.vlgmr.msra.gmra.mrb[0].mxu0 %v2113_v7  ;;  %1655 = vmatmul.mubr.bf16.vlgmr.msra.gmra.mrb[0].mxu1 %v2113_v7 }
  0x83   :  { %1500 = vmatpush1.bf16.msra.mxu0 %v2645_v8  ;;  %1664 = vmatpush1.bf16.msra.mxu1 %v2648_v9 }
  0x84   :  { %1501 = vmatprep.subr.bf16.mxu0 %v2653_v10  ;;  %1665 = vmatprep.subr.bf16.mxu1 %v2656_v12 }
  0x85   :  { %1531 = vmatprep.mubr.bf16.mxu0 %v2116_v13  ;;  %1695 = vmatprep.mubr.bf16.mxu1 %v2116_v13 }
  0x87   :  { %1502 = vmatpush1.bf16.msra.mxu0 %v2651_v14  ;;  %1666 = vmatpush1.bf16.msra.mxu1 %v2654_v15 }
  0x88   :  { %1503 = vmatprep.subr.bf16.mxu0 %v2659_v16  ;;  %1667 = vmatprep.subr.bf16.mxu1 %v2662_v17 }
  0x8b   :  { %1504 = vmatpush1.bf16.msra.mxu0 %v2657_v18  ;;  %1668 = vmatpush1.bf16.msra.mxu1 %v2660_v19 }
  0x8c   :  { %1505 = vmatprep.subr.bf16.mxu0 %v2665_v20  ;;  %1669 = vmatprep.subr.bf16.mxu1 %v2668_v21 }
  0x8f   :  { %1506 = vmatpush1.bf16.msra.mxu0 %v2663_v22  ;;  %1670 = vmatpush1.bf16.msra.mxu1 %v2666_v23 }
  0x90   :  { %1507 = vmatprep.subr.bf16.mxu0 %v2671_v24  ;;  %1671 = vmatprep.subr.bf16.mxu1 %v2674_v25 }
  0x93   :  { %1508 = vmatpush1.bf16.msra.mxu0 %v2669_v26  ;;  %1672 = vmatpush1.bf16.msra.mxu1 %v2672_v27 }
  0x94   :  { %1509 = vmatprep.subr.bf16.mxu0 %v2677_v28  ;;  %1673 = vmatprep.subr.bf16.mxu1 %v2680_v29 }
  0x97   :  { %1510 = vmatpush1.bf16.msra.mxu0 %v2675_v30  ;;  %1674 = vmatpush1.bf16.msra.mxu1 %v2678_v31 }
  0x98   :  { %1511 = vmatprep.subr.bf16.mxu0 %v2683_v32  ;;  %1675 = vmatprep.subr.bf16.mxu1 %v2686_v33 }
  0x9b   :  { %1512 = vmatpush1.bf16.msra.mxu0 %v2681_v34  ;;  %1676 = vmatpush1.bf16.msra.mxu1 %v2684_v35 }
  0x9c   :  { %1513 = vmatprep.subr.bf16.mxu0 %v2689_v36  ;;  %1677 = vmatprep.subr.bf16.mxu1 %v2692_v37 }
  0x9f   :  { %1514 = vmatpush1.bf16.msra.mxu0 %v2687_v38  ;;  %1678 = vmatpush1.bf16.msra.mxu1 %v2690_v39 }
  0xa0   :  { %1515 = vmatprep.subr.bf16.mxu0 %v2695_v40  ;;  %1679 = vmatprep.subr.bf16.mxu1 %v2698_v41 }
  0xa3   :  { %1516 = vmatpush1.bf16.msra.mxu0 %v2693_v42  ;;  %1680 = vmatpush1.bf16.msra.mxu1 %v2696_v43 }
  0xa4   :  { %1517 = vmatprep.subr.bf16.mxu0 %v2701_v44  ;;  %1681 = vmatprep.subr.bf16.mxu1 %v2704_v45 }
  0xa7   :  { %1518 = vmatpush1.bf16.msra.mxu0 %v2699_v46  ;;  %1682 = vmatpush1.bf16.msra.mxu1 %v2702_v47 }
  0xa8   :  { %1519 = vmatprep.subr.bf16.mxu0 %v2707_v48  ;;  %1683 = vmatprep.subr.bf16.mxu1 %v2710_v49 }
  0xab   :  { %1520 = vmatpush1.bf16.msra.mxu0 %v2705_v50  ;;  %1684 = vmatpush1.bf16.msra.mxu1 %v2708_v51 }
  0xac   :  { %1521 = vmatprep.subr.bf16.mxu0 %v2713_v52  ;;  %1685 = vmatprep.subr.bf16.mxu1 %v2716_v53 }
  0xaf   :  { %1522 = vmatpush1.bf16.msra.mxu0 %v2711_v54  ;;  %1686 = vmatpush1.bf16.msra.mxu1 %v2714_v55 }
  0xb0   :  { %1523 = vmatprep.subr.bf16.mxu0 %v2719_v56  ;;  %1687 = vmatprep.subr.bf16.mxu1 %v2722_v57 }
  0xb3   :  { %1524 = vmatpush1.bf16.msra.mxu0 %v2717_v58  ;;  %1688 = vmatpush1.bf16.msra.mxu1 %v2720_v59 }
  0xb4   :  { %10 = vsyncpa [#allocation3], 0  ;;  %1525 = vmatprep.subr.bf16.mxu0 %v2725_v60  ;;  %1689 = vmatprep.subr.bf16.mxu1 %v2728_v61  ;;  %v2731_v0 = vld [vmem:[%s3691_s1 + $0x5c4] ss:$16 sps:$4 sm:$0xff]   ;;  %v2734_v1 = vld [vmem:[%s3691_s1 + $0x5cc] ss:$16 sps:$4 sm:$0xff]   ;;  %v2115_v10 = vcombine.low %v3294_v11, %v3294_v11 }
  0xb5   :  { %v2729_v2 = vld [vmem:[%s3691_s1 + $0x5c0] ss:$16 sps:$4 sm:$0xff]   ;;  %v2732_v3 = vld [vmem:[%s3691_s1 + $0x5c8] ss:$16 sps:$4 sm:$0xff]   ;;  %v2737_v4 = vld [vmem:[%s3691_s1 + $0x5e4] ss:$16 sps:$4 sm:$0xff]  }
  0xb6   :  { %v2740_v5 = vld [vmem:[%s3691_s1 + $0x5ec] ss:$16 sps:$4 sm:$0xff]   ;;  %v2735_v6 = vld [vmem:[%s3691_s1 + $0x5e0] ss:$16 sps:$4 sm:$0xff]   ;;  %v2738_v7 = vld [vmem:[%s3691_s1 + $0x5e8] ss:$16 sps:$4 sm:$0xff]  }
  0xb7   :  { %1526 = vmatpush1.bf16.msra.mxu0 %v2723_v62  ;;  %1690 = vmatpush1.bf16.msra.mxu1 %v2726_v63  ;;  %v2745_v8 = vld [vmem:[%s3691_s1 + $0x604] ss:$16 sps:$4 sm:$0xff]   ;;  %v2748_v9 = vld [vmem:[%s3691_s1 + $0x60c] ss:$16 sps:$4 sm:$0xff]   ;;  %v2743_v12 = vld [vmem:[%s3691_s1 + $0x600] ss:$16 sps:$4 sm:$0xff]  }
  0xb8   :  { %1527 = vmatprep.subr.bf16.mxu0 %v2731_v0  ;;  %1691 = vmatprep.subr.bf16.mxu1 %v2734_v1  ;;  %v2746_v13 = vld [vmem:[%s3691_s1 + $0x608] ss:$16 sps:$4 sm:$0xff]   ;;  %v2751_v14 = vld [vmem:[%s3691_s1 + $0x624] ss:$16 sps:$4 sm:$0xff]   ;;  %v2754_v11 = vld [vmem:[%s3691_s1 + $0x62c] ss:$16 sps:$4 sm:$0xff]  }
  0xb9   :  { %v2749_v15 = vld [vmem:[%s3691_s1 + $0x620] ss:$16 sps:$4 sm:$0xff]   ;;  %v2752_v16 = vld [vmem:[%s3691_s1 + $0x628] ss:$16 sps:$4 sm:$0xff]   ;;  %v2757_v17 = vld [vmem:[%s3691_s1 + $0x644] ss:$16 sps:$4 sm:$0xff]  }
  0xba   :  { %v2760_v18 = vld [vmem:[%s3691_s1 + $0x64c] ss:$16 sps:$4 sm:$0xff]   ;;  %v2848_v19 = vmov 0   ;;  %v2755_v20 = vld [vmem:[%s3691_s1 + $0x640] ss:$16 sps:$4 sm:$0xff]  }
  0xbb   :  { %1528 = vmatpush1.bf16.msra.mxu0 %v2729_v2  ;;  %1692 = vmatpush1.bf16.msra.mxu1 %v2732_v3  ;;  %v2758_v21 = vld [vmem:[%s3691_s1 + $0x648] ss:$16 sps:$4 sm:$0xff]   ;;  %v2763_v22 = vld [vmem:[%s3691_s1 + $0x664] ss:$16 sps:$4 sm:$0xff]   ;;  %v2766_v23 = vld [vmem:[%s3691_s1 + $0x66c] ss:$16 sps:$4 sm:$0xff]  }
  0xbc   :  { %1529 = vmatprep.subr.bf16.mxu0 %v2737_v4  ;;  %1693 = vmatprep.subr.bf16.mxu1 %v2740_v5  ;;  %v2761_v24 = vld [vmem:[%s3691_s1 + $0x660] ss:$16 sps:$4 sm:$0xff]   ;;  %v2764_v25 = vld [vmem:[%s3691_s1 + $0x668] ss:$16 sps:$4 sm:$0xff]   ;;  %v2769_v26 = vld [vmem:[%s3691_s1 + $0x684] ss:$16 sps:$4 sm:$0xff]  }
  0xbd   :  { %v2772_v27 = vld [vmem:[%s3691_s1 + $0x68c] ss:$16 sps:$4 sm:$0xff]   ;;  %v2767_v28 = vld [vmem:[%s3691_s1 + $0x680] ss:$16 sps:$4 sm:$0xff]   ;;  %v2770_v29 = vld [vmem:[%s3691_s1 + $0x688] ss:$16 sps:$4 sm:$0xff]  }
  0xbe   :  { %v2775_v30 = vld [vmem:[%s3691_s1 + $0x6a4] ss:$16 sps:$4 sm:$0xff]   ;;  %v2778_v31 = vld [vmem:[%s3691_s1 + $0x6ac] ss:$16 sps:$4 sm:$0xff]   ;;  %v2773_v32 = vld [vmem:[%s3691_s1 + $0x6a0] ss:$16 sps:$4 sm:$0xff]  }
  0xbf   :  { %1530 = vmatpush1.bf16.msra.mxu0 %v2735_v6  ;;  %1694 = vmatpush1.bf16.msra.mxu1 %v2738_v7  ;;  %v2776_v33 = vld [vmem:[%s3691_s1 + $0x6a8] ss:$16 sps:$4 sm:$0xff]   ;;  %v2781_v34 = vld [vmem:[%s3691_s1 + $0x6c4] ss:$16 sps:$4 sm:$0xff]   ;;  %v2784_v35 = vld [vmem:[%s3691_s1 + $0x6cc] ss:$16 sps:$4 sm:$0xff]  }
  0xc0   :  { %1540 = vmatprep.subr.bf16.mxu0 %v2745_v8  ;;  %1704 = vmatprep.subr.bf16.mxu1 %v2748_v9  ;;  %v2779_v36 = vld [vmem:[%s3691_s1 + $0x6c0] ss:$16 sps:$4 sm:$0xff]   ;;  %v2782_v37 = vld [vmem:[%s3691_s1 + $0x6c8] ss:$16 sps:$4 sm:$0xff]   ;;  %v2787_v38 = vld [vmem:[%s3691_s1 + $0x6e4] ss:$16 sps:$4 sm:$0xff]  }
  0xc1   :  { %v2790_v39 = vld [vmem:[%s3691_s1 + $0x6ec] ss:$16 sps:$4 sm:$0xff]   ;;  %v2785_v40 = vld [vmem:[%s3691_s1 + $0x6e0] ss:$16 sps:$4 sm:$0xff]   ;;  %v2788_v41 = vld [vmem:[%s3691_s1 + $0x6e8] ss:$16 sps:$4 sm:$0xff]  }
  0xc2   :  { %1532 = vmatmul.mubr.bf16.vlgmr.msra.gmra.mrb[0].mxu0 %v2115_v10  ;;  %1696 = vmatmul.mubr.bf16.vlgmr.msra.gmra.mrb[0].mxu1 %v2115_v10  ;;  %v2792_v42 = vld [vmem:[%s3693_s3 + $0x40] sm:$0xff]   ;;  %v2791_v44 = vld [vmem:[%s3690_s0 + $0x18] ss:$0 sps:$4 sm:$0xff]   ;;  %v2796_v47 = vld [vmem:[%s3693_s3 + $0x48] sm:$0xff]   ;;  %s2849_s0 = smov [#allocation2]  }
  0xc3   :  { %1541 = vmatpush1.bf16.msra.mxu0 %v2743_v12  ;;  %1705 = vmatpush1.bf16.msra.mxu1 %v2746_v13  ;;  %v2793_v43 = vld [vmem:[%s3693_s3 + $0xc0] sm:$0xff]   ;;  %v2797_v48 = vld [vmem:[%s3693_s3 + $0xc8] sm:$0xff]   ;;  %v2800_v51 = vld [vmem:[%s3693_s3 + $0x50] sm:$0xff]   ;;  %v252_v12 = vlaneseq  ;;  %s2103_s10 = sshll.u32 %s2849_s0, 4  ;;  %s2104_s10 = int_to_ptr.vmem [resolvable:$true] %s2103_s10 }
  0xc4   :  { %1542 = vmatprep.subr.bf16.mxu0 %v2751_v14  ;;  %1706 = vmatprep.subr.bf16.mxu1 %v2754_v11  ;;  %v2794_v45 = vld [vmem:[%s3693_s3] sm:$0xff]   ;;  %v2798_v49 = vld [vmem:[%s3693_s3 + $0x8] sm:$0xff]   ;;  %v2801_v52 = vld [vmem:[%s3693_s3 + $0xd0] sm:$0xff]   ;;  %s2824_s11 = scalar_lea.vmem %s2104_s10, 128  ;;  %p2829_p1 = scmp.lt.s32.totalorder %s2104_s10, %s2104_s10 }
  0xc5   :  { %1572 = vmatprep.mubr.bf16.mxu0 %v2848_v19  ;;  %1736 = vmatprep.mubr.bf16.mxu1 %v2848_v19  ;;  %v2795_v46 = vld [vmem:[%s3693_s3 + $0x80] sm:$0xff]   ;;  %v2799_v50 = vld [vmem:[%s3693_s3 + $0x88] sm:$0xff]   ;;  %v2802_v53 = vld [vmem:[%s3693_s3 + $0x10] sm:$0xff]   ;;  %v253_v13 = vshrl.u32 %v252_v12, 7  ;;  %p2825_p0 = scmp.ne.s32.totalorder %s2104_s10, %s2824_s11  ;;  %p2830_p2 = scmp.lt.s32.totalorder %s2824_s11, %s2824_s11 }
  0xc6   :  { %v2803_v54 = vld [vmem:[%s3693_s3 + $0x90] sm:$0xff]   ;;  %v2804_v55 = vld [vmem:[%s3693_s3 + $0x58] sm:$0xff]   ;;  %v2808_v59 = vld [vmem:[%s3693_s3 + $0x60] sm:$0xff]  }
  0xc7   :  { %1543 = vmatpush1.bf16.msra.mxu0 %v2749_v15  ;;  %1707 = vmatpush1.bf16.msra.mxu1 %v2752_v16  ;;  %v2805_v56 = vld [vmem:[%s3693_s3 + $0xd8] sm:$0xff]   ;;  %v2809_v60 = vld [vmem:[%s3693_s3 + $0xe0] sm:$0xff]   ;;  %v2812_v63 = vld [vmem:[%s3693_s3 + $0x68] sm:$0xff]   ;;  %v254_v14 = vsub.s32 0, %v253_v13  ;;  %v262_v11 = vsub.s32 2, %v253_v13  ;;  %v258_v16 = vsub.s32 1, %v253_v13  ;;  %p2831_p3 = por %p2830_p2, %p2829_p1 }
  0xc8   :  { %1544 = vmatprep.subr.bf16.mxu0 %v2757_v17  ;;  %1708 = vmatprep.subr.bf16.mxu1 %v2760_v18  ;;  %v2806_v57 = vld [vmem:[%s3693_s3 + $0x18] sm:$0xff]   ;;  %v2810_v61 = vld [vmem:[%s3693_s3 + $0x20] sm:$0xff]   ;;  %v2813_v0 = vld [vmem:[%s3693_s3 + $0xe8] sm:$0xff]   ;;  %v266_v17 = vsub.s32 3, %v253_v13 }
  0xc9   :  { %v2807_v58 = vld [vmem:[%s3693_s3 + $0x98] sm:$0xff]   ;;  %v2811_v62 = vld [vmem:[%s3693_s3 + $0xa0] sm:$0xff]   ;;  %v2814_v1 = vld [vmem:[%s3693_s3 + $0x28] sm:$0xff]   ;;  %p2832_p4 = pnand %p2831_p3, %p2825_p0 }
  0xca   :  { %v2815_v2 = vld [vmem:[%s3693_s3 + $0xa8] sm:$0xff]   ;;  %v2816_v3 = vld [vmem:[%s3693_s3 + $0x70] sm:$0xff]   ;;  %v2820_v7 = vld [vmem:[%s3693_s3 + $0x78] sm:$0xff]  }
  0xcb   :  { %1545 = vmatpush1.bf16.msra.mxu0 %v2755_v20  ;;  %1709 = vmatpush1.bf16.msra.mxu1 %v2758_v21  ;;  %v2817_v4 = vld [vmem:[%s3693_s3 + $0xf0] sm:$0xff]   ;;  %v2821_v8 = vld [vmem:[%s3693_s3 + $0xf8] sm:$0xff]   ;;  %v250_v15 = vld [vmem:[%s3692_s2] sm:$0xf] }
  0xcc   :  { %1546 = vmatprep.subr.bf16.mxu0 %v2763_v22  ;;  %1710 = vmatprep.subr.bf16.mxu1 %v2766_v23  ;;  %v2818_v5 = vld [vmem:[%s3693_s3 + $0x30] sm:$0xff]   ;;  %v2822_v9 = vld [vmem:[%s3693_s3 + $0x38] sm:$0xff]   ;;  %v255_v18 = vrot.slane %v250_v15, %v254_v14  ;;  %v263_v19 = vrot.slane %v250_v15, %v262_v11  ;;  %v259_v20 = vrot.slane %v250_v15, %v258_v16 }
  0xcd   :  { %v2819_v6 = vld [vmem:[%s3693_s3 + $0xb0] sm:$0xff]   ;;  %v2823_v10 = vld [vmem:[%s3693_s3 + $0xb8] sm:$0xff]   ;;  %v267_v21 = vrot.slane %v250_v15, %v266_v17 }
  0xcf   :  { %1547 = vmatpush1.bf16.msra.mxu0 %v2761_v24  ;;  %1711 = vmatpush1.bf16.msra.mxu1 %v2764_v25 }
  0xd0   :  { %1548 = vmatprep.subr.bf16.mxu0 %v2769_v26  ;;  %1712 = vmatprep.subr.bf16.mxu1 %v2772_v27 }
  0xd3   :  { %1549 = vmatpush1.bf16.msra.mxu0 %v2767_v28  ;;  %1713 = vmatpush1.bf16.msra.mxu1 %v2770_v29 }
  0xd4   :  { %1550 = vmatprep.subr.bf16.mxu0 %v2775_v30  ;;  %1714 = vmatprep.subr.bf16.mxu1 %v2778_v31 }
  0xd7   :  { %1551 = vmatpush1.bf16.msra.mxu0 %v2773_v32  ;;  %1715 = vmatpush1.bf16.msra.mxu1 %v2776_v33 }
  0xd8   :  { %1552 = vmatprep.subr.bf16.mxu0 %v2781_v34  ;;  %1716 = vmatprep.subr.bf16.mxu1 %v2784_v35 }
  0xdb   :  { %1553 = vmatpush1.bf16.msra.mxu0 %v2779_v36  ;;  %1717 = vmatpush1.bf16.msra.mxu1 %v2782_v37 }
  0xdc   :  { %1554 = vmatprep.subr.bf16.mxu0 %v2787_v38  ;;  %1718 = vmatprep.subr.bf16.mxu1 %v2790_v39 }
  0xdf   :  { %1555 = vmatpush1.bf16.msra.mxu0 %v2785_v40  ;;  %1719 = vmatpush1.bf16.msra.mxu1 %v2788_v41 }
  0xe0   :  { %2375 = vmatprep.subr.bf16.mxu0 %v2792_v42  ;;  %2397 = vmatprep.subr.bf16.mxu1 %v2793_v43 }
  0xe2   :  { %1573 = vmatmul.mubr.bf16.vlgmr.msra.gmra.mrb[0].mxu0 %v2791_v44  ;;  %1737 = vmatmul.mubr.bf16.vlgmr.msra.gmra.mrb[0].mxu1 %v2791_v44  ;;  %v2342_v44 = vld [vmem:[%s3694_s4] ss:$0 sm:$0xff] }
  0xe3   :  { %2376 = vmatpush3.bf16.msra.mxu0 %v2794_v45  ;;  %2398 = vmatpush3.bf16.msra.mxu1 %v2795_v46 }
  0xe4   :  { %2377 = vmatprep.subr.bf16.mxu0 %v2796_v47  ;;  %2399 = vmatprep.subr.bf16.mxu1 %v2797_v48 }
  0xe7   :  { %2378 = vmatpush3.bf16.msra.mxu0 %v2798_v49  ;;  %2400 = vmatpush3.bf16.msra.mxu1 %v2799_v50 }
  0xe8   :  { %2379 = vmatprep.subr.bf16.mxu0 %v2800_v51  ;;  %2401 = vmatprep.subr.bf16.mxu1 %v2801_v52 }
  0xeb   :  { %2380 = vmatpush3.bf16.msra.mxu0 %v2802_v53  ;;  %2402 = vmatpush3.bf16.msra.mxu1 %v2803_v54 }
  0xec   :  { %2381 = vmatprep.subr.bf16.mxu0 %v2804_v55  ;;  %2403 = vmatprep.subr.bf16.mxu1 %v2805_v56 }
  0xef   :  { %2382 = vmatpush3.bf16.msra.mxu0 %v2806_v57  ;;  %2404 = vmatpush3.bf16.msra.mxu1 %v2807_v58 }
  0xf0   :  { %2383 = vmatprep.subr.bf16.mxu0 %v2808_v59  ;;  %2405 = vmatprep.subr.bf16.mxu1 %v2809_v60 }
  0xf3   :  { %2384 = vmatpush3.bf16.msra.mxu0 %v2810_v61  ;;  %2406 = vmatpush3.bf16.msra.mxu1 %v2811_v62 }
  0xf4   :  { %2385 = vmatprep.subr.bf16.mxu0 %v2812_v63  ;;  %2407 = vmatprep.subr.bf16.mxu1 %v2813_v0 }
  0xf7   :  { %2386 = vmatpush3.bf16.msra.mxu0 %v2814_v1  ;;  %2408 = vmatpush3.bf16.msra.mxu1 %v2815_v2 }
  0xf8   :  { %2387 = vmatprep.subr.bf16.mxu0 %v2816_v3  ;;  %2409 = vmatprep.subr.bf16.mxu1 %v2817_v4 }
  0xfb   :  { %2388 = vmatpush3.bf16.msra.mxu0 %v2818_v5  ;;  %2410 = vmatpush3.bf16.msra.mxu1 %v2819_v6 }
  0xfc   :  { %2389 = vmatprep.subr.bf16.mxu0 %v2820_v7  ;;  %2411 = vmatprep.subr.bf16.mxu1 %v2821_v8 }
  0xff   :  { %2390 = vmatpush3.bf16.msra.mxu0 %v2822_v9  ;;  %2412 = vmatpush3.bf16.msra.mxu1 %v2823_v10 }
 0x1b5   :  { %v1574_v22 = vpop.f32.mrb[0].mxu0  ;;  %v1738_v23 = vpop.f32.mrb[0].mxu1 }
 0x1b6   :  { %v2419_v24 = vadd.f32 %v1574_v22, %v255_v18  ;;  %v2421_v25 = vadd.f32 %v1738_v23, %v263_v19  ;;  %v1576_v26 = vpop.f32.mrb[1].mxu0  ;;  %v1740_v27 = vpop.f32.mrb[1].mxu1 }
 0x1b7   :  { %v2420_v28 = vadd.f32 %v1576_v26, %v259_v20  ;;  %v2422_v29 = vadd.f32 %v1740_v27, %v267_v21  ;;  %v1578_v30 = vpop.f32.mrb[2].mxu0  ;;  %v1742_v31 = vpop.f32.mrb[2].mxu1 }
 0x1b8   :  { %v1745_v32 = vmax.f32 %v2419_v24, 0.0  ;;  %v1747_v33 = vmax.f32 %v2421_v25, 0.0  ;;  %v1579_v34 = vpop.f32.mrb[3].mxu0  ;;  %v1743_v35 = vpop.f32.mrb[3].mxu1 }
 0x1b9   :  { %v1746_v36 = vmax.f32 %v2420_v28, 0.0  ;;  %v1748_v37 = vmax.f32 %v2422_v29, 0.0 }
 0x1ba   :  { %v1749_v40 = vpack.c.bf16 %v1745_v32, %v1745_v32  ;;  %v1751_v41 = vpack.c.bf16 %v1747_v33, %v1747_v33 }
 0x1bb   :  { %v1750_v38 = vpack.c.bf16 %v1746_v36, %v1746_v36  ;;  %v1752_v39 = vpack.c.bf16 %v1748_v37, %v1748_v37 }
 0x1bd   :  { %2048 = vmatprep.mubr.bf16.mxu0 %v1750_v38  ;;  %2088 = vmatprep.mubr.bf16.mxu1 %v1752_v39 }
 0x1be   :  { %2049 = vmatmul.mubr.bf16.vlgmr.msra.gmra.mrb[4].mxu0 %v1749_v40  ;;  %2089 = vmatmul.mubr.bf16.vlgmr.msra.gmra.mrb[4].mxu1 %v1751_v41 }
 0x291   :  { %v2391_v42 = vpop.f32.mrb[4].mxu0  ;;  %v2413_v43 = vpop.f32.mrb[4].mxu1 }
 0x292   :  { %v2392_v45 = vpop.f32.mrb[5].mxu0  ;;  %v2414_v46 = vpop.f32.mrb[5].mxu1 }
 0x293   :  { %v2393_v47 = vadd.f32 %v2392_v45, %v2391_v42  ;;  %v2415_v48 = vadd.f32 %v2414_v46, %v2413_v43  ;;  %v2394_v49 = vpop.f32.mrb[6].mxu0  ;;  %v2416_v50 = vpop.f32.mrb[6].mxu1 }
 0x294   :  { %v2395_v51 = vpop.f32.mrb[7].mxu0  ;;  %v2417_v52 = vpop.f32.mrb[7].mxu1 }
 0x295   :  { %v2051_v53 = vadd.f32 %v2393_v47, %v2342_v44 }
 0x297   :  { %v2091_v54 = vadd.f32 %v2415_v48, %v2051_v53 }
 0x299   :  { %2096 = vst [vmem:[#allocation2] sm:$0xff] %v2091_v54 }
 0x29a   :  { %2835 = shalt.err (!%p2832_p4)
}
 0x29b   :  { %s2836_s13 = scalar_lea.hbm %s3695_s5, 128 }
 0x29c   :  { %p2837_p5 = scmp.ne.s32.totalorder %s3695_s5, %s2836_s13  ;;  %p2840_p6 = scmp.lt.u32.totalorder %s2836_s13, %s3695_s5 }
 0x29e   :  { %p2842_p7 = pnand %p2840_p6, %p2837_p5 }
 0x2a0   :  { %2845 = shalt.err (!%p2842_p7)
}
 0x2a1   :  { %2106 = dma.vmem_to_hbm [thread:$0]  %s2104_s10, 128, %s3695_s5, [#allocation3]  }
 0x2a2   :  { %2846 = dma.done.wait [#allocation3], 128  }
 0x2a3   :  { %2847 = vsyncadd [#allocation3], 4294967168 }
 0x2a4   :  { %2110 = vsyncpa [#allocation3], 1 }

</bundles_post_ra>
